<compile_context>
chip_gen: v7x
topology: tpu7x:2x2x1
jax: 0.10.0
libtpu: 0.0.40
codegen_flags: <defaults>
</compile_context>

<pallas_src>
import jax
import jax.numpy as jnp
from jax.experimental import pallas as pl
from jax.experimental.pallas import tpu as pltpu


# ----------------------------------------------------------------------------
# Kernels
# ----------------------------------------------------------------------------
def _stats_kernel(x_ref, mu_ref, sigma_ref):
    """Per-row mean / unbiased std over the last axis for one (TR, L) block.

    Two-pass formulation (mu first, then sum((x - mu)^2)): the block is
    VMEM-resident so the second pass is free at the memory-bound roofline and
    avoids the catastrophic cancellation of the sum-of-squares formula.
    NOTE: L == 1 yields 0/0 = NaN, matching torch.std(unbiased=True) on N=1.
    """
    L = x_ref.shape[-1]
    x = x_ref[...].astype(jnp.float32)                     # (TR, L)
    mu = jnp.sum(x, axis=-1, keepdims=True) * (1.0 / L)    # (TR, 1)
    xc = x - mu
    var = jnp.sum(xc * xc, axis=-1, keepdims=True) / (L - 1)
    mu_ref[...] = mu
    sigma_ref[...] = jnp.sqrt(var)


def _normalize_kernel(x_ref, scale_ref, shift_ref, o_ref):
    """Elementwise out = x * scale + shift with per-row scale/shift (TR, 1)."""
    x = x_ref[...].astype(jnp.float32)                     # (TR, TL)
    o_ref[...] = (x * scale_ref[...] + shift_ref[...]).astype(o_ref.dtype)


def _make_fused_kernel(batch, length, eps):
    """Fused single-pass MixStyle: x resident in VMEM, 1 HBM read + 1 write."""

    def kernel(perm_ref, lam_ref, x_hbm, o_ref,
               x_vmem, dma_sem, mu_s, sg_s, sc_s, sh_s):
        b = pl.program_id(0)

        @pl.when(b == 0)
        def _():
            # Single HBM read of x into the persistent VMEM copy.
            cp = pltpu.make_async_copy(x_hbm, x_vmem, dma_sem)
            cp.start()
            cp.wait()

            # Phase 1a: per-(batch, channel) statistics, one batch slab at a
            # time so fp32 temporaries stay bounded to one (C, L) slab.
            @pl.loop(0, batch)
            def _(i):
                xb = x_vmem[i].astype(jnp.float32)          # (C, L)
                mu = jnp.sum(xb, axis=-1, keepdims=True) * (1.0 / length)
                xc = xb - mu
                var = jnp.sum(xc * xc, axis=-1, keepdims=True) / (length - 1)
                mu_s[i] = mu
                sg_s[i] = jnp.sqrt(var)

            # Phase 1b: perm gather + Beta-lambda mixing folded into a single
            # per-(b, c) affine (scale, shift).  perm / lam live in SMEM.
            @pl.loop(0, batch)
            def _(i):
                p = perm_ref[i]
                lam_i = lam_ref[i]
                mu_i, sg_i = mu_s[i], sg_s[i]
                mu_p, sg_p = mu_s[p], sg_s[p]
                mu_mix = lam_i * mu_i + (1.0 - lam_i) * mu_p
                sg_mix = lam_i * sg_i + (1.0 - lam_i) * sg_p
                scale = sg_mix * (1.0 / (sg_i + eps))
                sc_s[i] = scale
                sh_s[i] = mu_mix - mu_i * scale

        # Phase 2: normalize batch b from the resident copy; one HBM write.
        xb = x_vmem[b].astype(jnp.float32)                  # (C, L)
        o_ref[0] = (xb * sc_s[b] + sh_s[b]).astype(o_ref.dtype)

    return kernel


# ----------------------------------------------------------------------------
# VMEM budgeting / tile selection
# ----------------------------------------------------------------------------
def _vmem_capacity_bytes():
    try:
        return int(pltpu.get_tpu_info().vmem_capacity_bytes)
    except Exception:
        return 64 * 1024 * 1024  # conservative default (v7x per-TC VMEM)


def _sublane(dtype):
    # Native sublane packing: 8 rows for 4-byte, 16 for bf16, 32 for int8/fp8.
    return max(8, 32 // jnp.dtype(dtype).itemsize)


def _floor_to(x, m):
    return (x // m) * m


def _ceil_to(x, m):
    return ((x + m - 1) // m) * m


def _stats_row_tile(R, L, itemsize, budget, sub):
    # VMEM per row in the stats pass: double-buffered input rows plus ~2 fp32
    # temporaries (x and x-mu); the (TR, 1) outputs are negligible, so this
    # pass effectively gets a much bigger block than the normalize pass.
    per_row = L * (2 * itemsize + 8) + 4 * 128 * 4
    max_rows = max(1, budget // per_row)
    if max_rows >= R or R <= sub:
        tr = R
    else:
        tr = max(sub, _floor_to(min(max_rows, R), sub))
    # TODO(synk): for pathologically large L (even `sub` rows exceed budget)
    # an L-tiled accumulation axis would be needed; instead the caller bumps
    # vmem_limit_bytes to cover the chosen tile.
    if tr == R and R >= 2 * sub:
        # Keep >= 2 grid steps so a v7x megacore can split across its 2 TCs.
        tr = _ceil_to(pl.cdiv(R, 2), sub)
    return tr


def _norm_tiles(R, L, itemsize, budget, sub):
    # VMEM per element: double-buffered input + double-buffered output +
    # ~2 fp32 temporaries.
    per_elem = 4 * itemsize + 8
    max_elems = max(1, budget // per_elem)
    if max_elems >= L or L <= 128:
        tl = L                                   # lane-dense full rows
        max_rows = max(1, max_elems // max(L, 1))
        if max_rows >= R or R <= sub:
            tr = R
        else:
            tr = max(sub, _floor_to(min(max_rows, R), sub))
    else:
        tr = min(R, sub)
        tl = min(L, max(128, _floor_to(max_elems // max(tr, 1), 128)))
    # Keep >= 2 grid steps (v7x has 2 TensorCores; a 1-step grid idles one).
    if pl.cdiv(R, tr) * pl.cdiv(L, tl) < 2:
        if R >= 2 * sub:
            tr = _ceil_to(pl.cdiv(R, 2), sub)
        elif L >= 256:
            tl = _ceil_to(pl.cdiv(L, 2), 128)
    return tr, tl


def _est_vmem_stats(tr, L, itemsize):
    return tr * L * (2 * itemsize + 8) + 4 * _ceil_to(tr, 8) * 128 * 4 + (1 << 20)


def _est_vmem_norm(tr, tl, itemsize):
    return tr * tl * (4 * itemsize + 8) + 4 * _ceil_to(tr, 8) * 128 * 4 + (1 << 20)


def _est_vmem_fused(B, C, L, itemsize):
    c_pad = _ceil_to(max(C, 1), 8)
    return (B * C * L * itemsize           # resident copy of x
            + 2 * C * L * itemsize         # double-buffered output block
            + 3 * C * L * 4                # fp32 temporaries for one batch slab
            + 4 * B * c_pad * 128 * 4      # mu/sigma/scale/shift scratch
            + (1 << 20))


# ----------------------------------------------------------------------------
# Pallas wrappers
# ----------------------------------------------------------------------------
def _compute_stats(x2, tr, vmem_limit):
    R, L = x2.shape
    # NOTE: (R, 1) outputs lower to masked stores, but they are tiny; a
    # lane-dense layout would need an in-kernel transpose (XLU) for no real win.
    return pl.pallas_call(
        _stats_kernel,
        out_shape=(
            jax.ShapeDtypeStruct((R, 1), jnp.float32),
            jax.ShapeDtypeStruct((R, 1), jnp.float32),
        ),
        grid_spec=pltpu.PrefetchScalarGridSpec(
            num_scalar_prefetch=0,
            grid=(pl.cdiv(R, tr),),
            in_specs=[pl.BlockSpec((tr, L), lambda i: (i, 0))],
            out_specs=(
                pl.BlockSpec((tr, 1), lambda i: (i, 0)),
                pl.BlockSpec((tr, 1), lambda i: (i, 0)),
            ),
        ),
        compiler_params=pltpu.CompilerParams(
            dimension_semantics=("parallel",),
            vmem_limit_bytes=int(vmem_limit),
        ),
    )(x2)


def _apply_affine(x2, scale, shift, tr, tl, vmem_limit, donate):
    R, L = x2.shape
    kwargs = {}
    if donate:
        # Only useful when the caller actually donates x; otherwise XLA copies.
        kwargs["input_output_aliases"] = {0: 0}
    return pl.pallas_call(
        _normalize_kernel,
        out_shape=jax.ShapeDtypeStruct((R, L), x2.dtype),
        grid_spec=pltpu.PrefetchScalarGridSpec(
            num_scalar_prefetch=0,
            grid=(pl.cdiv(R, tr), pl.cdiv(L, tl)),
            in_specs=[
                pl.BlockSpec((tr, tl), lambda i, j: (i, j)),
                pl.BlockSpec((tr, 1), lambda i, j: (i, 0)),
                pl.BlockSpec((tr, 1), lambda i, j: (i, 0)),
            ],
            out_specs=pl.BlockSpec((tr, tl), lambda i, j: (i, j)),
        ),
        compiler_params=pltpu.CompilerParams(
            dimension_semantics=("parallel", "parallel"),
            vmem_limit_bytes=int(vmem_limit),
        ),
        **kwargs,
    )(x2, scale, shift)


def _mixstyle_fused(x, perm, lam, eps, vmem_limit):
    B, C, L = x.shape
    kernel = _make_fused_kernel(B, L, eps)
    return pl.pallas_call(
        kernel,
        out_shape=jax.ShapeDtypeStruct((B, C, L), x.dtype),
        grid_spec=pltpu.PrefetchScalarGridSpec(
            num_scalar_prefetch=2,                     # perm, lam -> SMEM
            grid=(B,),
            in_specs=[pl.BlockSpec(memory_space=pl.ANY)],   # x stays in HBM
            out_specs=pl.BlockSpec((1, C, L), lambda b, perm, lam: (b, 0, 0)),
            scratch_shapes=[
                pltpu.VMEM((B, C, L), x.dtype),        # resident copy of x
                pltpu.SemaphoreType.DMA(()),
                pltpu.VMEM((B, C, 1), jnp.float32),    # mu
                pltpu.VMEM((B, C, 1), jnp.float32),    # sigma
                pltpu.VMEM((B, C, 1), jnp.float32),    # scale
                pltpu.VMEM((B, C, 1), jnp.float32),    # shift
            ],
        ),
        compiler_params=pltpu.CompilerParams(
            # Step 0 computes stats for all batches; later steps depend on it.
            dimension_semantics=("arbitrary",),
            vmem_limit_bytes=int(vmem_limit),
        ),
    )(perm.astype(jnp.int32), lam.astype(jnp.float32), x)


def mixstyle_apply(x, perm, lam, eps=1e-6, use_fused=None, donate=False):
    """MixStyle mixing path (always mixes).

    use_fused: True -> force single-pass fused kernel (x resident in VMEM),
               False -> force two-pass (stats kernel + affine kernel),
               None  -> auto-select based on VMEM capacity.
    """
    B, C, L = x.shape
    itemsize = jnp.dtype(x.dtype).itemsize
    cap = _vmem_capacity_bytes()
    budget = min(int(cap * 0.7), 96 * 1024 * 1024)
    sub = _sublane(x.dtype)

    est_fused = _est_vmem_fused(B, C, L, itemsize)
    if use_fused is None:
        use_fused = est_fused <= int(cap * 0.6)
    if use_fused:
        limit = min(int(cap * 0.9), est_fused + (16 << 20))
        return _mixstyle_fused(x, perm, lam, eps, limit)

    # ---------------- two-pass path (large x) ----------------
    R = B * C
    x2 = x.reshape(R, L)

    # Pass 1: per-row statistics (one HBM read of x).
    tr_s = _stats_row_tile(R, L, itemsize, budget, sub)
    stats_limit = min(int(cap * 0.9),
                      max(budget, _est_vmem_stats(tr_s, L, itemsize)))
    mu, sigma = _compute_stats(x2, tr_s, stats_limit)      # (R, 1) fp32 each

    # Tiny plain-JAX mixing on (B, C, 1) stats: perm gather + Beta-lambda mix
    # + exact reciprocal, folded into a per-row affine (scale, shift).
    mu3 = mu.reshape(B, C, 1)
    sg3 = sigma.reshape(B, C, 1)
    lam3 = lam.reshape(B, 1, 1).astype(jnp.float32)
    mu_mixed = lam3 * mu3 + (1.0 - lam3) * mu3[perm]
    sg_mixed = lam3 * sg3 + (1.0 - lam3) * sg3[perm]
    scale3 = sg_mixed / (sg3 + eps)
    shift3 = mu_mixed - mu3 * scale3
    scale = scale3.reshape(R, 1)
    shift = shift3.reshape(R, 1)

    # Pass 2: elementwise x*scale + shift (one HBM read + one write of x).
    tr_n, tl_n = _norm_tiles(R, L, itemsize, budget, sub)
    norm_limit = min(int(cap * 0.9),
                     max(budget, _est_vmem_norm(tr_n, tl_n, itemsize)))
    out2 = _apply_affine(x2, scale, shift, tr_n, tl_n, norm_limit, donate)
    return out2.reshape(B, C, L)


def compute_perm(domain_labels):
    """perm[i] = first j with domain_labels[j] != domain_labels[i], else i."""
    B = domain_labels.shape[0]
    idx = jnp.arange(B, dtype=jnp.int32)
    diff = domain_labels[None, :] != domain_labels[:, None]    # (B, B)
    has_diff = jnp.any(diff, axis=1)
    first = jnp.argmax(diff, axis=1).astype(jnp.int32)
    return jnp.where(has_diff, first, idx)


def mixstyle_forward(x, domain_labels, key, p=0.5, alpha=0.1, training=True,
                     activated=True):
    """Full MixStyle forward matching the PyTorch module (returns the array)."""
    if not training or not activated:
        return x
    k_gate, k_lam = jax.random.split(key)
    gate = jax.random.uniform(k_gate, ())                       # torch.rand(1)
    lam = jax.random.beta(k_lam, alpha, alpha, shape=(x.shape[0],)).astype(
        jnp.float32)
    perm = compute_perm(domain_labels)
    # Skip all kernel work (HBM reads/writes) when the gate says "no mix".
    return jax.lax.cond(
        gate > p,
        lambda op: op,
        lambda op: mixstyle_apply(op, perm, lam),
        x,
    )


# ----------------------------------------------------------------------------
# Pure-JAX reference (mirrors the PyTorch math) and self-test
# ----------------------------------------------------------------------------
def _reference_mix(x, perm, lam, eps=1e-6):
    mu = x.mean(axis=2, keepdims=True)
    sigma = jnp.std(x, axis=2, ddof=1, keepdims=True)
    x_normed = (x - mu) / (sigma + eps)
    l = lam.reshape(-1, 1, 1)
    mu_mixed = l * mu + (1.0 - l) * mu[perm]
    sigma_mixed = l * sigma + (1.0 - l) * sigma[perm]
    return x_normed * sigma_mixed + mu_mixed


if __name__ == "__main__":
    B, C, L = 4, 8, 128
    key = jax.random.PRNGKey(0)
    kx, klam, kfwd = jax.random.split(key, 3)

    x = jax.random.normal(kx, (B, C, L), dtype=jnp.float32) * 2.0 + 0.5
    domain_labels = jnp.array([0, 0, 1, 1], dtype=jnp.int32)

    perm = compute_perm(domain_labels)
    lam = jax.random.beta(klam, 0.1, 0.1, shape=(B,)).astype(jnp.float32)

    ref = _reference_mix(x, perm, lam)

    # Fused single-pass path (x resident in VMEM: 1 HBM read + 1 write).
    out_fused = jax.block_until_ready(
        mixstyle_apply(x, perm, lam, use_fused=True))
    assert out_fused.shape == x.shape and out_fused.dtype == x.dtype
    assert jnp.allclose(out_fused, ref, atol=1e-4, rtol=1e-4), \
        "fused path mismatch vs reference"

    # Two-pass path (stats kernel + affine kernel), forced for coverage.
    out_2p = jax.block_until_ready(
        mixstyle_apply(x, perm, lam, use_fused=False))
    assert out_2p.shape == x.shape and out_2p.dtype == x.dtype
    assert jnp.allclose(out_2p, ref, atol=1e-4, rtol=1e-4), \
        "two-pass path mismatch vs reference"

    # Full gated forward path (Bernoulli gate via lax.cond).
    out_fwd = jax.block_until_ready(
        mixstyle_forward(x, domain_labels, kfwd, p=0.5, alpha=0.1,
                         training=True))
    assert out_fwd.shape == x.shape and out_fwd.dtype == x.dtype

    print("KERNEL_OK")
</pallas_src>

<mosaic_0001>
module attributes {stable_mosaic.version = 11 : i64} {
  func.func @kernel(%arg0: i32, %arg1: memref<4xi32, #tpu.memory_space<smem>>, %arg2: memref<4xf32, #tpu.memory_space<smem>>, %arg3: memref<4x8x128xf32, #tpu.memory_space<any>>, %arg4: memref<1x8x128xf32, #tpu.memory_space<vmem>>, %arg5: memref<4x8x128xf32, #tpu.memory_space<vmem>>, %arg6: memref<!tpu.dma_semaphore, #tpu.memory_space<semaphore_mem>>, %arg7: memref<4x8x1xf32, #tpu.memory_space<vmem>>, %arg8: memref<4x8x1xf32, #tpu.memory_space<vmem>>, %arg9: memref<4x8x1xf32, #tpu.memory_space<vmem>>, %arg10: memref<4x8x1xf32, #tpu.memory_space<vmem>>) attributes {dimension_semantics = [#tpu.dimension_semantics<arbitrary>], iteration_bounds = array<i64: 4>, scalar_prefetch = 2 : i64, scratch_operands = 6 : i64, tpu.core_type = #tpu.core_type<tc>, window_params = [{}, {transform_indices = @transform_1, window_bounds = array<i64: 1, 8, 128>}]} {
    %c0_i32 = arith.constant 0 : i32
    %0 = arith.cmpi eq, %arg0, %c0_i32 : i32
    %1 = arith.extui %0 : i1 to i32
    %c0_i32_0 = arith.constant 0 : i32
    %2 = arith.cmpi ne, %1, %c0_i32_0 : i32
    scf.if %2 {
      tpu.enqueue_dma source(%arg3 : memref<4x8x128xf32, #tpu.memory_space<any>>) target(%arg5 : memref<4x8x128xf32, #tpu.memory_space<vmem>>) target_semaphore(%arg6 : memref<!tpu.dma_semaphore, #tpu.memory_space<semaphore_mem>>)
      tpu.wait_dma2 semaphore(%arg6 : memref<!tpu.dma_semaphore, #tpu.memory_space<semaphore_mem>>) src(%arg3 : memref<4x8x128xf32, #tpu.memory_space<any>>) dst(%arg5 : memref<4x8x128xf32, #tpu.memory_space<vmem>>)
      %c0_i32_9 = arith.constant 0 : i32
      %c4_i32 = arith.constant 4 : i32
      %19 = arith.addi %c0_i32_9, %c4_i32 : i32
      %c1_i32 = arith.constant 1 : i32
      scf.for %arg11 = %c0_i32_9 to %19 step %c1_i32  : i32 {
        %c1_i32_15 = arith.constant 1 : i32
        %21 = arith.muli %arg11, %c1_i32_15 : i32
        %c0_i32_16 = arith.constant 0 : i32
        %22 = arith.addi %c0_i32_16, %21 : i32
        %23 = arith.index_cast %22 : i32 to index
        %c0_17 = arith.constant 0 : index
        %c0_18 = arith.constant 0 : index
        %24 = vector.load %arg5[%23, %c0_17, %c0_18] : memref<4x8x128xf32, #tpu.memory_space<vmem>>, vector<1x8x128xf32>
        %25 = vector.shape_cast %24 : vector<1x8x128xf32> to vector<8x128xf32>
        %cst = arith.constant dense<0.000000e+00> : vector<8xf32>
        %26 = vector.multi_reduction <add>, %25, %cst [1] : vector<8x128xf32> to vector<8xf32>
        %27 = vector.shape_cast %26 : vector<8xf32> to vector<8x1xf32>
        %cst_19 = arith.constant 7.812500e-03 : f32
        %28 = vector.broadcast %cst_19 : f32 to vector<8x1xf32>
        %29 = arith.mulf %27, %28 : vector<8x1xf32>
        %30 = vector.broadcast %29 : vector<8x1xf32> to vector<8x128xf32>
        %31 = arith.subf %25, %30 : vector<8x128xf32>
        %32 = arith.mulf %31, %31 : vector<8x128xf32>
        %cst_20 = arith.constant dense<0.000000e+00> : vector<8xf32>
        %33 = vector.multi_reduction <add>, %32, %cst_20 [1] : vector<8x128xf32> to vector<8xf32>
        %34 = vector.shape_cast %33 : vector<8xf32> to vector<8x1xf32>
        %cst_21 = arith.constant 1.270000e+02 : f32
        %35 = vector.broadcast %cst_21 : f32 to vector<8x1xf32>
        %36 = arith.divf %34, %35 : vector<8x1xf32>
        %37 = arith.index_cast %22 : i32 to index
        %c0_22 = arith.constant 0 : index
        %c0_23 = arith.constant 0 : index
        %38 = vector.load %arg7[%37, %c0_22, %c0_23] : memref<4x8x1xf32, #tpu.memory_space<vmem>>, vector<1x8x1xf32>
        %39 = vector.shape_cast %38 : vector<1x8x1xf32> to vector<8x1xf32>
        %40 = vector.shape_cast %29 : vector<8x1xf32> to vector<1x8x1xf32>
        tpu.vector_store %arg7[%37, %c0_22, %c0_23], %40 {strides = array<i32>} : memref<4x8x1xf32, #tpu.memory_space<vmem>>, vector<1x8x1xf32>,
        %41 = math.sqrt %36 : vector<8x1xf32>
        %42 = arith.index_cast %22 : i32 to index
        %c0_24 = arith.constant 0 : index
        %c0_25 = arith.constant 0 : index
        %43 = vector.load %arg8[%42, %c0_24, %c0_25] : memref<4x8x1xf32, #tpu.memory_space<vmem>>, vector<1x8x1xf32>
        %44 = vector.shape_cast %43 : vector<1x8x1xf32> to vector<8x1xf32>
        %45 = vector.shape_cast %41 : vector<8x1xf32> to vector<1x8x1xf32>
        tpu.vector_store %arg8[%42, %c0_24, %c0_25], %45 {strides = array<i32>} : memref<4x8x1xf32, #tpu.memory_space<vmem>>, vector<1x8x1xf32>,
      }
      %c4_i32_10 = arith.constant 4 : i32
      %c0_i32_11 = arith.constant 0 : i32
      %c4_i32_12 = arith.constant 4 : i32
      %20 = arith.addi %c0_i32_11, %c4_i32_12 : i32
      %c1_i32_13 = arith.constant 1 : i32
      scf.for %arg11 = %c0_i32_11 to %20 step %c1_i32_13  : i32 {
        %c1_i32_15 = arith.constant 1 : i32
        %21 = arith.muli %arg11, %c1_i32_15 : i32
        %c0_i32_16 = arith.constant 0 : i32
        %22 = arith.addi %c0_i32_16, %21 : i32
        %23 = arith.index_cast %22 : i32 to index
        %24 = memref.load %arg1[%23] : memref<4xi32, #tpu.memory_space<smem>>
        %25 = arith.index_cast %22 : i32 to index
        %26 = memref.load %arg2[%25] : memref<4xf32, #tpu.memory_space<smem>>
        %27 = arith.index_cast %22 : i32 to index
        %c0_17 = arith.constant 0 : index
        %c0_18 = arith.constant 0 : index
        %28 = vector.load %arg7[%27, %c0_17, %c0_18] : memref<4x8x1xf32, #tpu.memory_space<vmem>>, vector<1x8x1xf32>
        %29 = vector.shape_cast %28 : vector<1x8x1xf32> to vector<8x1xf32>
        %30 = arith.index_cast %22 : i32 to index
        %c0_19 = arith.constant 0 : index
        %c0_20 = arith.constant 0 : index
        %31 = vector.load %arg8[%30, %c0_19, %c0_20] : memref<4x8x1xf32, #tpu.memory_space<vmem>>, vector<1x8x1xf32>
        %32 = vector.shape_cast %31 : vector<1x8x1xf32> to vector<8x1xf32>
        %33 = arith.index_cast %24 : i32 to index
        %c0_21 = arith.constant 0 : index
        %c0_22 = arith.constant 0 : index
        %34 = vector.load %arg7[%33, %c0_21, %c0_22] : memref<4x8x1xf32, #tpu.memory_space<vmem>>, vector<1x8x1xf32>
        %35 = vector.shape_cast %34 : vector<1x8x1xf32> to vector<8x1xf32>
        %36 = arith.index_cast %24 : i32 to index
        %c0_23 = arith.constant 0 : index
        %c0_24 = arith.constant 0 : index
        %37 = vector.load %arg8[%36, %c0_23, %c0_24] : memref<4x8x1xf32, #tpu.memory_space<vmem>>, vector<1x8x1xf32>
        %38 = vector.shape_cast %37 : vector<1x8x1xf32> to vector<8x1xf32>
        %39 = vector.broadcast %26 : f32 to vector<8x1xf32>
        %40 = arith.mulf %39, %29 : vector<8x1xf32>
        %cst = arith.constant 1.000000e+00 : f32
        %41 = arith.subf %cst, %26 : f32
        %42 = vector.broadcast %41 : f32 to vector<8x1xf32>
        %43 = arith.mulf %42, %35 : vector<8x1xf32>
        %44 = arith.addf %40, %43 : vector<8x1xf32>
        %45 = vector.broadcast %26 : f32 to vector<8x1xf32>
        %46 = arith.mulf %45, %32 : vector<8x1xf32>
        %cst_25 = arith.constant 1.000000e+00 : f32
        %47 = arith.subf %cst_25, %26 : f32
        %48 = vector.broadcast %47 : f32 to vector<8x1xf32>
        %49 = arith.mulf %48, %38 : vector<8x1xf32>
        %50 = arith.addf %46, %49 : vector<8x1xf32>
        %cst_26 = arith.constant 9.99999997E-7 : f32
        %51 = vector.broadcast %cst_26 : f32 to vector<8x1xf32>
        %52 = arith.addf %32, %51 : vector<8x1xf32>
        %cst_27 = arith.constant 1.000000e+00 : f32
        %53 = vector.broadcast %cst_27 : f32 to vector<8x1xf32>
        %54 = arith.divf %53, %52 : vector<8x1xf32>
        %55 = arith.mulf %50, %54 : vector<8x1xf32>
        %56 = arith.index_cast %22 : i32 to index
        %c0_28 = arith.constant 0 : index
        %c0_29 = arith.constant 0 : index
        %57 = vector.load %arg9[%56, %c0_28, %c0_29] : memref<4x8x1xf32, #tpu.memory_space<vmem>>, vector<1x8x1xf32>
        %58 = vector.shape_cast %57 : vector<1x8x1xf32> to vector<8x1xf32>
        %59 = vector.shape_cast %55 : vector<8x1xf32> to vector<1x8x1xf32>
        tpu.vector_store %arg9[%56, %c0_28, %c0_29], %59 {strides = array<i32>} : memref<4x8x1xf32, #tpu.memory_space<vmem>>, vector<1x8x1xf32>,
        %60 = arith.mulf %29, %55 : vector<8x1xf32>
        %61 = arith.subf %44, %60 : vector<8x1xf32>
        %62 = arith.index_cast %22 : i32 to index
        %c0_30 = arith.constant 0 : index
        %c0_31 = arith.constant 0 : index
        %63 = vector.load %arg10[%62, %c0_30, %c0_31] : memref<4x8x1xf32, #tpu.memory_space<vmem>>, vector<1x8x1xf32>
        %64 = vector.shape_cast %63 : vector<1x8x1xf32> to vector<8x1xf32>
        %65 = vector.shape_cast %61 : vector<8x1xf32> to vector<1x8x1xf32>
        tpu.vector_store %arg10[%62, %c0_30, %c0_31], %65 {strides = array<i32>} : memref<4x8x1xf32, #tpu.memory_space<vmem>>, vector<1x8x1xf32>,
      }
      %c4_i32_14 = arith.constant 4 : i32
    } else {
    }
    %3 = arith.index_cast %arg0 : i32 to index
    %c0 = arith.constant 0 : index
    %c0_1 = arith.constant 0 : index
    %4 = vector.load %arg5[%3, %c0, %c0_1] : memref<4x8x128xf32, #tpu.memory_space<vmem>>, vector<1x8x128xf32>
    %5 = vector.shape_cast %4 : vector<1x8x128xf32> to vector<8x128xf32>
    %6 = arith.index_cast %arg0 : i32 to index
    %c0_2 = arith.constant 0 : index
    %c0_3 = arith.constant 0 : index
    %7 = vector.load %arg9[%6, %c0_2, %c0_3] : memref<4x8x1xf32, #tpu.memory_space<vmem>>, vector<1x8x1xf32>
    %8 = vector.shape_cast %7 : vector<1x8x1xf32> to vector<8x1xf32>
    %9 = vector.broadcast %8 : vector<8x1xf32> to vector<8x128xf32>
    %10 = arith.mulf %5, %9 : vector<8x128xf32>
    %11 = arith.index_cast %arg0 : i32 to index
    %c0_4 = arith.constant 0 : index
    %c0_5 = arith.constant 0 : index
    %12 = vector.load %arg10[%11, %c0_4, %c0_5] : memref<4x8x1xf32, #tpu.memory_space<vmem>>, vector<1x8x1xf32>
    %13 = vector.shape_cast %12 : vector<1x8x1xf32> to vector<8x1xf32>
    %14 = vector.broadcast %13 : vector<8x1xf32> to vector<8x128xf32>
    %15 = arith.addf %10, %14 : vector<8x128xf32>
    %c0_6 = arith.constant 0 : index
    %c0_7 = arith.constant 0 : index
    %c0_8 = arith.constant 0 : index
    %16 = vector.load %arg4[%c0_6, %c0_7, %c0_8] : memref<1x8x128xf32, #tpu.memory_space<vmem>>, vector<1x8x128xf32>
    %17 = vector.shape_cast %16 : vector<1x8x128xf32> to vector<8x128xf32>
    %18 = vector.shape_cast %15 : vector<8x128xf32> to vector<1x8x128xf32>
    tpu.vector_store %arg4[%c0_6, %c0_7, %c0_8], %18 {strides = array<i32>} : memref<1x8x128xf32, #tpu.memory_space<vmem>>, vector<1x8x128xf32>,
    return
  }
  func.func @transform_1(%arg0: i32, %arg1: memref<4xi32, #tpu.memory_space<smem>>, %arg2: memref<4xf32, #tpu.memory_space<smem>>) -> (i32, i32, i32) {
    %c0_i32 = arith.constant 0 : i32
    %c0_i32_0 = arith.constant 0 : i32
    %c0_i32_1 = arith.constant 0 : i32
    return %arg0, %c0_i32, %c0_i32_0 : i32, i32, i32
  }
}

</mosaic_0001>

<bundles_post_ra>
// kernel: tpu_custom_call.1
= control target key start
LH: loop header
LB: loop body
LE: loop exit
PB: predicated region body
PF: predicated region fallthrough
CT: control target
= control target key end

     0   :  { %s617_s0 = inlined_call_operand.hbm [shape: s32[4], index: 0, kind: input, shape index: {}]   ;;  %s618_s2 = inlined_call_operand.hbm [shape: f32[4,8,128], index: 2, kind: input, shape index: {}]   ;;  %s619_s3 = inlined_call_operand.hbm [shape: f32[4,8,128], index: 3, kind: output, shape index: {}]   ;;  %s620_s1 = inlined_call_operand.vmem [shape: f32[4], index: 1, kind: input, shape index: {}]  }
   0x1   :  { %s331_s14 = scalar_lea.hbm %s617_s0, 16 }
   0x2   :  { %p332_p0 = scmp.ne.s32.totalorder %s617_s0, %s331_s14  ;;  %p335_p1 = scmp.lt.u32.totalorder %s331_s14, %s617_s0 }
   0x4   :  { %p337_p2 = pnand %p335_p1, %p332_p0 }
   0x6   :  { %340 = shalt.err (!%p337_p2)  }
   0x7   :  { %s451_s19 = smov [#allocation9]   ;;  %s10_s24 = sshll.u32 %s620_s1, 4  ;;  %s11_s24 = int_to_ptr.vmem [resolvable:$true] %s10_s24 }
   0x8   :  { %9 = dma.hbm_to_smem %s617_s0, 16, %s451_s19, [#allocation8] }
   0x9   :  { %s341_s25 = scalar_lea.vmem %s11_s24, 16  ;;  %p346_p4 = scmp.lt.s32.totalorder %s11_s24, %s11_s24 }
   0xa   :  { %p342_p3 = scmp.ne.s32.totalorder %s11_s24, %s341_s25  ;;  %p347_p5 = scmp.lt.s32.totalorder %s341_s25, %s341_s25 }
   0xc   :  { %p348_p6 = por %p347_p5, %p346_p4 }
   0xe   :  { %p349_p7 = pnand %p348_p6, %p342_p3 }
  0x10   :  { %352 = shalt.err (!%p349_p7)  }
  0x11   :  { %s452_s26 = smov [#allocation10]  }
  0x12   :  { %13 = dma.vmem_to_smem %s11_s24, 16, %s452_s26, [#allocation8] }
  0x13   :  { %423 = dma.done.wait [#allocation8], 32 }
  0x14   :  { %424 = vsyncadd [#allocation8], 4294967264 }
  0x15   :  { %15 = sfence }
  0x16   :  { %16 = vsyncpa [#allocation12], 0 }
  0x17   :  { %18 = vsyncpa [#allocation12 + $0x1], 0  ;;  %s491_s0 = smov 0   ;;  %s493_s27 = smov 0  }
  0x18   :  { %s495_s1 = smov 0  }
  0x19 LB: > { %s261_s28 = sadd.s32 4294967295, %s441_s1   ;;  %s508_s29 = sadd.s32 1, %s441_s1   ;;  %s441_s1 = sphi %s495_s1, %s625_s1   ;;  %s437_s27 = sphi %s493_s27, %s624_s27   ;;  %s433_s0 = sphi %s491_s0, %s623_s0  }
  0x1a   : > { %s27_s30 = ssub.s32 %s441_s1, %s508_s29  ;;  %s30_s4 = sadd.s32 1, %s437_s27 }
  0x1b   : > { %p28_p8 = scmp.eq.s32.totalorder %s27_s30, 0  ;;  %p262_p9 = scmp.ne.s32.totalorder %s27_s30, 0 }
  0x1c   : > { %p34_p10 = scmp.eq.s32.totalorder %s441_s1, 3  ;;  %p39_p11 = scmp.ne.s32.totalorder %s437_s27, %s433_s0 }
  0x1d   : > { %s517_s5 = scalar_select %p28_p8, %s437_s27, %s30_s4  }
  0x1e   : > { %p519_p12 = por %p262_p9, %p34_p10  ;;  %p40_p13 = scmp.eq.s32.totalorder %s261_s28, 3 }
  0x1f   : > { %p263_p1 = scmp.ge.s32.totalorder %s441_s1, 4 }
  0x20   : > { %p523_p0 = por %p40_p13, %p39_p11  ;;  %s54_s8 = sand.u32 (!%p263_p1), 1, %s437_s27  }
  0x21   : > { %49 = sbr.rel (%p263_p1) target bundleno = 548 (0x224), region = 12  ;;  %s531_s9 = sshll.u32 (!%p263_p1), %s54_s8, 3 }
  0x22   : > { %s56_s10 = scalar_lea.vmem (!%p263_p1), [#allocation11], %s531_s9  ;;  %p265_p2 = scmp.ne.s32.totalorder (!%p263_p1), %s441_s1, 0 }
  0x28   : > { %60 = sbr.rel (%p265_p2) target bundleno = 397 (0x18d), region = 16  ;;  %s453_s11 = smov (!%p265_p2), [#allocation2]  }
  0x29   : > { %s68_s12 = sshll.u32 (!%p265_p2), %s453_s11, 4  ;;  %s353_s15 = scalar_lea.hbm (!%p265_p2), %s618_s2, 512  ;;  %s69_s12 = int_to_ptr.vmem [resolvable:$true] %s68_s12 }
  0x2a   : > { %p354_p3 = scmp.ne.s32.totalorder (!%p265_p2), %s618_s2, %s353_s15  ;;  %p357_p4 = scmp.lt.u32.totalorder (!%p265_p2), %s353_s15, %s618_s2 }
  0x2c   : > { %p359_p5 = pnand (!%p265_p2), %p357_p4, %p354_p3 }
  0x2f   : > { %362 = shalt.err (!%p359_p5)  }
  0x30   : > { %s363_s20 = scalar_lea.vmem %s69_s12, 512  ;;  %p368_p7 = scmp.lt.s32.totalorder %s69_s12, %s69_s12 }
  0x31   : > { %p364_p6 = scmp.ne.s32.totalorder %s69_s12, %s363_s20  ;;  %p369_p8 = scmp.lt.s32.totalorder %s363_s20, %s363_s20 }
  0x33   : > { %p370_p9 = por %p369_p8, %p368_p7 }
  0x35   : > { %p371_p10 = pnand %p370_p9, %p364_p6 }
  0x37   : > { %374 = shalt.err (!%p371_p10)  }
  0x38   : > { %71 = dma.hbm_to_vmem [thread:$0]  %s618_s2, 512, %s69_s12, [#allocation3] }
  0x39   : > { %425 = dma.done.wait [#allocation3], 512 }
  0x3a   : > { %426 = vsyncadd [#allocation3], 4294966784  ;;  %s547_s23 = smov 0  }
  0x3b LB: >> { %s266_s24 = sshll.u32 %s445_s23, 3  ;;  %vm95_vm0 = vcmask 7168   ;;  %s81_s23 = sadd.s32 1, %s445_s23   ;;  %s445_s23 = sphi %s547_s23, %s81_s23  }
  0x3c   : >> { %s83_s25 = scalar_lea.vmem [#allocation2], %s266_s24  ;;  %s94_s26 = scalar_lea.vmem [#allocation4], %s266_s24 }
  0x3d   : >> { %v84_v0 = vld [vmem:[%s83_s25] sm:$0xff]  ;;  %s104_s28 = scalar_lea.vmem [#allocation5], %s266_s24  ;;  %p78_p11 = scmp.ge.s32.totalorder %s81_s23, 4  }
  0x3e   : >> { %85 = vadd.xlane.f32.xlu0 %v84_v0  ;;  %s554_s30 = smov (%p78_p11), 0  }
  0xcb   : >> { %v86_v1 = vpop.xlane.xlu0 %85 }
  0xcc   : >> { %v87_v2 = vmul.f32 0.0078125, %v86_v1 }
  0xce   : >> { %96 = vst.msk [vmem:[%s94_s26] sm:$0xff] %vm95_vm0, %v87_v2  ;;  %v88_v3 = vsub.f32 %v84_v0, %v87_v2 }
  0xd0   : >> { %v89_v4 = vmul.f32 %v88_v3, %v88_v3 }
  0xd2   : >> { %90 = vadd.xlane.f32.xlu0 %v89_v4 }
 0x15f   : >> { %v91_v5 = vpop.xlane.xlu0 %90 }
 0x160   : >> { %v93_v6 = vmul.f32 0.007874016, %v91_v5 }
 0x162   : >> { %326 = vrsqrt.f32 %v93_v6  ;;  %vm99_vm1 = vcmp.eq.f32.partialorder %v93_v6, inf  ;;  %v102_v9 = vand.u32 2147483648, %v93_v6  ;;  %vm101_vm2 = vcmp.eq.f32.partialorder %v93_v6, 0.0 }
 0x16b   : > { %80 = sbr.rel (!%p78_p11) target bundleno = 59 (0x3b), region = 78 }
 0x16c   : >> { %v327_v7 = vpop.eup %326 }
 0x16d   : >> { %v98_v8 = vmul.f32 %v327_v7, %v93_v6 }
 0x16f   : >> { %v100_v10 = vsel %vm99_vm1, %v93_v6, %v98_v8 }
 0x170   : >> { %v103_v11 = vsel %vm101_vm2, %v102_v9, %v100_v10 }
 0x171   : >> { %105 = vst.msk [vmem:[%s104_s28] sm:$0xff] %vm95_vm0, %v103_v11 }
 0x172 LB: >> { %s112_s4 = sld [smem:[#allocation9 + %s449_s30]]  ;;  %s267_s12 = sshll.u32 %s449_s30, 3  ;;  %s449_s30 = sphi %s554_s30, %s111_s30  }
 0x173   : >> { %s113_s11 = sld [smem:[#allocation10 + %s449_s30]]  ;;  %s117_s13 = scalar_lea.vmem [#allocation5], %s267_s12 }
 0x174   : >> { %s115_s17 = scalar_lea.vmem [#allocation4], %s267_s12  ;;  %s137_s19 = scalar_lea.vmem [#allocation6], %s267_s12 }
 0x175   : >> { %v116_v19 = vld [vmem:[%s115_s17] sm:$0xff]  ;;  %s142_s20 = scalar_lea.vmem [#allocation7], %s267_s12  ;;  %s111_s30 = sadd.s32 1, %s449_s30  }
 0x176   : >> { %p108_p13 = scmp.ge.s32.totalorder %s111_s30, 4  }
 0x178   : >> { %v118_v12 = vld [vmem:[%s117_s13] sm:$0xff]  ;;  %s268_s14 = sshll.u32 %s112_s4, 3 }
 0x179   : >> { %v133_v13 = vadd.f32 1e-06, %v118_v12  ;;  %v124_v14 = vstv %s113_s11  ;;  %s126_s15 = ssub.f32 1.0, %s113_s11  ;;  %s122_s16 = scalar_lea.vmem [#allocation5], %s268_s14 }
 0x17a   : >> { %v123_v15 = vld [vmem:[%s122_s16] sm:$0xff]  ;;  %v130_v17 = vmul.f32 %v124_v14, %v118_v12  ;;  %s120_s18 = scalar_lea.vmem [#allocation4], %s268_s14  ;;  %v125_v22 = vmul.f32 %v124_v14, %v116_v19 }
 0x17b   : >> { %328 = vrcp.f32 %v133_v13  ;;  %v127_v16 = vstv %s126_s15  ;;  %v121_v20 = vld [vmem:[%s120_s18] sm:$0xff] }
 0x17c   : >> { %v131_v18 = vmul.f32 %v127_v16, %v123_v15  ;;  %v128_v23 = vmul.f32 %v127_v16, %v121_v20 }
 0x17e   : >> { %v132_v21 = vadd.f32 %v131_v18, %v130_v17  ;;  %v129_v26 = vadd.f32 %v128_v23, %v125_v22 }
 0x185   : >> { %v329_v24 = vpop.eup %328 }
 0x186   : >> { %v136_v25 = vmul.f32 %v329_v24, %v132_v21  ;;  %110 = sbr.rel (!%p108_p13) target bundleno = 370 (0x172), region = 89 }
 0x188   : >> { %139 = vst.msk [vmem:[%s137_s19] sm:$0xff] %vm95_vm0, %v136_v25  ;;  %v140_v27 = vmul.f32 %v136_v25, %v116_v19 }
 0x18a   : >> { %v141_v28 = vsub.f32 %v129_v26, %v140_v27 }
 0x18c   : >> { %143 = vst.msk [vmem:[%s142_s20] sm:$0xff] %vm95_vm0, %v141_v28 }
 0x18d PF: > { %s269_s21 = sshll.u32 %s441_s1, 3  ;;  %v454_v29 = vmov 0   ;;  %s271_s25 = sshll.u32 %s441_s1, 7 }
 0x18e   : > { %330 = vset.pattern.permute.xlu0 %v454_v29  ;;  %s147_s22 = scalar_lea.vmem [#allocation6], %s269_s21  ;;  %s155_s23 = scalar_lea.vmem [#allocation7], %s269_s21 }
 0x18f   : > { %v148_v30 = vld [vmem:[%s147_s22] sm:$0xff]  ;;  %s145_s24 = scalar_lea.vmem [#allocation2], %s269_s21  ;;  %s178_s26 = sshll.u32 %s56_s10, 4  ;;  %s576_s26 = int_to_ptr.vmem [resolvable:$true] %s178_s26 }
 0x190   : > { %151 = vperm.xlu0 %330, %v148_v30   ;;  %v146_v33 = vld [vmem:[%s145_s24] sm:$0xff]  ;;  %s574_s4 = scalar_lea.hbm %s619_s3, %s271_s25  ;;  %s165_s11 = scalar_lea.sflag [#allocation12], %s54_s8 }
 0x191   : > { %s375_s12 = scalar_lea.vmem %s576_s26, 128  ;;  %s455_s13 = smov [#allocation11]  }
 0x192   : > { %p376_p1 = scmp.ne.s32.totalorder %s576_s26, %s375_s12  ;;  %s379_s14 = sshll.u32 %s455_s13, 4  ;;  %s380_s14 = int_to_ptr.vmem [resolvable:$false] %s379_s14 }
 0x193   : > { %v156_v31 = vld [vmem:[%s155_s23] sm:$0xff]  ;;  %s381_s15 = scalar_lea.vmem %s380_s14, 256  ;;  %p382_p4 = scmp.lt.s32.totalorder %s576_s26, %s380_s14 }
 0x194   : > { %159 = vperm.xlu0 %330, %v156_v31   ;;  %p377_p2 = pnand %p376_p1, %p519_p12  ;;  %p383_p5 = scmp.lt.s32.totalorder %s381_s15, %s375_s12 }
 0x196   : > { %p378_p3 = pneg %p377_p2  ;;  %p384_p6 = por %p383_p5, %p382_p4 }
 0x198   : > { %p385_p7 = pnand %p384_p6, %p378_p3 }
 0x20f   : > { %v152_v32 = vpop.permute.xlu0 %151 }
 0x210   : > { %v154_v34 = vmul.f32 %v152_v32, %v146_v33 }
 0x213   : > { %v160_v35 = vpop.permute.xlu0 %159 }
 0x214   : > { %v162_v36 = vadd.f32 %v160_v35, %v154_v34 }
 0x216   : > { %163 = vst [vmem:[%s56_s10] sm:$0xff] %v162_v36 }
 0x217   : > { %388 = shalt.err (!%p385_p7)
}
 0x218   : > { %s389_s8 = scalar_lea.hbm %s574_s4, 128  ;;  %s393_s16 = scalar_lea.hbm %s619_s3, 512 }
 0x219   : > { %p390_p8 = scmp.ne.s32.totalorder %s574_s4, %s389_s8  ;;  %p394_p11 = scmp.lt.u32.totalorder %s574_s4, %s619_s3 }
 0x21a   : > { %p395_p13 = scmp.lt.u32.totalorder %s393_s16, %s389_s8  ;;  %p397_p2 = scmp.lt.u32.totalorder %s389_s8, %s574_s4 }
 0x21b   : > { %p391_p9 = pnand %p390_p8, %p519_p12 }
 0x21c   : > { %p396_p1 = por %p395_p13, %p394_p11 }
 0x21d   : > { %p392_p10 = pneg %p391_p9 }
 0x21e   : > { %p398_p3 = por %p397_p2, %p396_p1 }
 0x220   : > { %p399_p4 = pnand %p398_p3, %p392_p10 }
 0x222   : > { %402 = shalt.err (!%p399_p4)
}
 0x223   : > { %275 = dma.vmem_to_hbm [thread:$0]  (%p519_p12), %s576_s26, 128, %s574_s4, %s165_s11  }
 0x224 PF: > { %p281_p5 = scmp.ge.s32.totalorder %s441_s1, 1  ;;  %s190_s19 = sand.u32 1, %s433_s0  }
 0x225   : > { %s191_s20 = scalar_lea.sflag [#allocation12], %s190_s19 }
 0x226   : > { %p278_p6 = pnand %p281_p5, %p523_p0 }
 0x228   : > { %428 = dma.done.wait (!%p278_p6), %s191_s20, 128  }
 0x229   : > { %430 = vsyncadd (!%p278_p6), %s191_s20, 4294967168  ;;  %p21_p7 = scmp.ge.s32.totalorder %s508_s29, 5   ;;  %s623_s0 = smov %s437_s27 }
 0x22a   : > { %s624_s27 = smov %s517_s5  ;;  %s625_s1 = smov %s508_s29 }
 0x22b   :  { %23 = sbr.rel (!%p21_p7) target bundleno = 25 (0x19), region = 100 }
 0x232   :  { %196 = vsyncpa [#allocation12], 1 }
 0x233   :  { %198 = vsyncpa [#allocation12 + $0x1], 1 }
 0x234   :  { %199 = vsyncmov [#allocation3] }
 0x237   :  { %s200_s1 = vpop.sfrf %199 }
 0x238   :  { %p274_p12 = scmp.ne.s32.totalorder %s200_s1, 0 }
 0x23a   :  { %204 = shalt.err (%p274_p12)  }

</bundles_post_ra>
